<compile_context>
chip_gen: v7x
topology: tpu7x:2x2x1
jax: 0.10.0
libtpu: 0.0.40
codegen_flags: <defaults>
</compile_context>

<pallas_src>
import functools

import jax
import jax.numpy as jnp
from jax import lax
from jax.experimental import pallas as pl
from jax.experimental.pallas import tpu as pltpu


def _round_up(x, m):
    return ((x + m - 1) // m) * m


def _pick_chunk_rows(blk_b, f_pad, elt):
    # Largest 8/16/32-row chunk that divides the batch block and keeps the
    # live tanh-chain chunk within a handful of vregs (<= ~32 KiB).
    budget_rows = max(8, (32 * 1024) // (f_pad * elt))
    for c in (32, 16, 8):
        if c <= budget_rows and blk_b % c == 0:
            return c
    return blk_b  # tiny batch (< 8 rows): single chunk


def _long_fusion_kernel(x_ref, w_ref, b_ref, o_ref, *, n_iter, chunk_rows):
    """One batch block: y = x @ W_t + b, then (relu . tanh)^n_iter, chunked."""
    blk_b = x_ref.shape[0]
    n_chunks = blk_b // chunk_rows  # wrapper guarantees divisibility

    def chunk_body(c, carry):
        r0 = pl.multiple_of(c * chunk_rows, chunk_rows)
        xc = x_ref[pl.ds(r0, chunk_rows), :]
        # MXU matmul; weight already laid out [F_in, F_pad] -> no transpose.
        y = jnp.dot(xc, w_ref[...], preferred_element_type=jnp.float32)
        y = y + b_ref[...]
        # (relu . tanh)^n == tanh^(n-1) . relu . tanh  (tanh keeps x >= 0 at >= 0)
        if n_iter > 0:
            y = jnp.maximum(jnp.tanh(y), jnp.float32(0.0))
            for _ in range(n_iter - 1):
                y = jnp.tanh(y)
        o_ref[pl.ds(r0, chunk_rows), :] = y.astype(o_ref.dtype)
        return carry

    lax.fori_loop(0, n_chunks, chunk_body, 0, unroll=(n_chunks <= 8))


def long_fusion_sample(x, weight, bias, *, n_iter=10, block_b=512):
    """x: [B, F_in] f32, weight: [F_out, F_in] f32, bias: [F_out] f32."""
    B, F_in = x.shape
    F_out = weight.shape[0]
    elt = jnp.dtype(x.dtype).itemsize

    # --- Lane-dense padding of the output feature dim (multiple of 128). ---
    F_pad = _round_up(F_out, 128)
    if F_pad != F_out:
        weight = jnp.pad(weight, ((0, F_pad - F_out), (0, 0)))
        bias = jnp.pad(bias, (0, F_pad - F_out))
    # One-time wrapper transpose -> MXU-native [K, N] layout.
    w_t = jnp.transpose(weight)          # [F_in, F_pad]
    b2 = bias.reshape(1, F_pad)

    # --- Batch tiling: >= 2 grid steps whenever B > 8 (v7x megacore), tiles a
    # multiple of 8 sublanes, capped at block_b (512 ~ v6e/v5e roofline). ---
    if B <= 8:
        blk_b = B
    else:
        blk_b = min(_round_up(block_b, 8), 8 * pl.cdiv(B, 16))

    def vmem_need(bb):
        # x & out double-buffered; weight/bias single-buffered (Buffered(1)).
        return (2 * bb * F_in + 2 * bb * F_pad + F_in * F_pad + F_pad) * elt

    # Keep the working set comfortably under v7x's 64 MiB physical VMEM.
    while blk_b > 8 and vmem_need(blk_b) > (40 << 20):
        blk_b = max(8, _round_up(blk_b // 2, 8))
    # TODO(synk): for very large F_in / F_out add K- and N- grid axes with an
    # f32 accumulator scratch instead of keeping the full weight resident.

    vmem_limit = int(min(max(2 * vmem_need(blk_b), 32 << 20), 48 << 20))
    grid = (pl.cdiv(B, blk_b),)
    chunk_rows = _pick_chunk_rows(blk_b, F_pad, elt)

    kernel = functools.partial(
        _long_fusion_kernel, n_iter=n_iter, chunk_rows=chunk_rows
    )
    cost = pl.CostEstimate(
        flops=2 * B * F_in * F_pad,
        transcendentals=n_iter * B * F_pad,
        bytes_accessed=elt * (B * F_in + F_in * F_pad + F_pad + B * F_pad),
    )

    def build(single_buffer_consts):
        const_kwargs = (
            dict(pipeline_mode=pl.Buffered(1)) if single_buffer_consts else {}
        )
        return pl.pallas_call(
            kernel,
            out_shape=jax.ShapeDtypeStruct((B, F_pad), x.dtype),
            grid_spec=pl.GridSpec(
                grid=grid,
                in_specs=[
                    pl.BlockSpec((blk_b, F_in), lambda i: (i, 0)),
                    pl.BlockSpec((F_in, F_pad), lambda i: (0, 0), **const_kwargs),
                    pl.BlockSpec((1, F_pad), lambda i: (0, 0), **const_kwargs),
                ],
                out_specs=pl.BlockSpec((blk_b, F_pad), lambda i: (i, 0)),
            ),
            compiler_params=pltpu.CompilerParams(
                dimension_semantics=("parallel",),
                vmem_limit_bytes=vmem_limit,
            ),
            cost_estimate=cost,
        )

    try:
        out = build(True)(x, w_t, b2)
    except Exception:
        # pipeline_mode=pl.Buffered(1) not supported by this JAX build; the
        # only cost of the fallback is double-buffering the constant weight.
        out = build(False)(x, w_t, b2)

    return out[:, :F_out] if F_pad != F_out else out


if __name__ == "__main__":
    # Small shapes consistent with the module's forward.
    B, F_IN, F_OUT, N_ITER = 8, 32, 64, 10

    key = jax.random.PRNGKey(0)
    kx, kw, kb = jax.random.split(key, 3)

    # Deterministic parameter init (uniform, PyTorch-Linear-like scale).
    bound = 1.0 / (F_IN ** 0.5)
    x = jax.random.normal(kx, (B, F_IN), dtype=jnp.float32)
    weight = jax.random.uniform(kw, (F_OUT, F_IN), jnp.float32, -bound, bound)
    bias = jax.random.uniform(kb, (F_OUT,), jnp.float32, -bound, bound)

    out = long_fusion_sample(x, weight, bias, n_iter=N_ITER)
    out = jax.block_until_ready(out)

    # Reference: literal Linear followed by (Tanh, ReLU) applied iter times.
    ref = x @ weight.T + bias
    for _ in range(N_ITER):
        ref = jnp.maximum(jnp.tanh(ref), 0.0)

    assert out.shape == (B, F_OUT)
    assert jnp.allclose(out, ref, atol=1e-5, rtol=1e-5)

    print("KERNEL_OK")
</pallas_src>

<mosaic_0001>
module attributes {stable_mosaic.version = 11 : i64} {
  func.func @_long_fusion_kernel(%arg0: i32, %arg1: memref<8x32xf32, #tpu.memory_space<vmem>>, %arg2: memref<32x128xf32, #tpu.memory_space<vmem>>, %arg3: memref<1x128xf32, #tpu.memory_space<vmem>>, %arg4: memref<8x128xf32, #tpu.memory_space<vmem>>) attributes {dimension_semantics = [#tpu.dimension_semantics<parallel>], iteration_bounds = array<i64: 1>, scalar_prefetch = 0 : i64, scratch_operands = 0 : i64, tpu.core_type = #tpu.core_type<tc>, window_params = [{transform_indices = @transform_0, window_bounds = array<i64: 8, 32>}, {pipeline_mode = #tpu.pipeline_mode<synchronous>, transform_indices = @transform_1, window_bounds = array<i64: 32, 128>}, {pipeline_mode = #tpu.pipeline_mode<synchronous>, transform_indices = @transform_2, window_bounds = array<i64: 1, 128>}, {transform_indices = @transform_3, window_bounds = array<i64: 8, 128>}]} {
    %c0_i32 = arith.constant 0 : i32
    %c8_i32 = arith.constant 8 : i32
    %0 = arith.muli %c0_i32, %c8_i32 : i32
    %1 = tpu.assume_multiple %0, 8 : i32
    %2 = arith.index_cast %1 : i32 to index
    %c0 = arith.constant 0 : index
    %3 = vector.load %arg1[%2, %c0] : memref<8x32xf32, #tpu.memory_space<vmem>>, vector<8x32xf32>
    %c0_0 = arith.constant 0 : index
    %c0_1 = arith.constant 0 : index
    %4 = vector.load %arg2[%c0_0, %c0_1] : memref<32x128xf32, #tpu.memory_space<vmem>>, vector<32x128xf32>
    %cst = arith.constant dense<0.000000e+00> : vector<8x128xf32>
    %5 = tpu.matmul %3, %4, %cst {dimension_numbers = #tpu.dot_dimension_numbers<[1], [0], [0], [1], [0, 0, 1, 1], [], []>} : vector<8x32xf32>, vector<32x128xf32>, vector<8x128xf32> -> vector<8x128xf32>
    %c0_2 = arith.constant 0 : index
    %c0_3 = arith.constant 0 : index
    %6 = vector.load %arg3[%c0_2, %c0_3] : memref<1x128xf32, #tpu.memory_space<vmem>>, vector<1x128xf32>
    %7 = vector.broadcast %6 : vector<1x128xf32> to vector<8x128xf32>
    %8 = arith.addf %5, %7 : vector<8x128xf32>
    %9 = math.tanh %8 : vector<8x128xf32>
    %cst_4 = arith.constant 0.000000e+00 : f32
    %10 = vector.broadcast %cst_4 : f32 to vector<8x128xf32>
    %11 = arith.maximumf %9, %10 : vector<8x128xf32>
    %12 = math.tanh %11 : vector<8x128xf32>
    %13 = math.tanh %12 : vector<8x128xf32>
    %14 = math.tanh %13 : vector<8x128xf32>
    %15 = math.tanh %14 : vector<8x128xf32>
    %16 = math.tanh %15 : vector<8x128xf32>
    %17 = math.tanh %16 : vector<8x128xf32>
    %18 = math.tanh %17 : vector<8x128xf32>
    %19 = math.tanh %18 : vector<8x128xf32>
    %20 = math.tanh %19 : vector<8x128xf32>
    %21 = arith.index_cast %1 : i32 to index
    %c0_5 = arith.constant 0 : index
    %22 = vector.load %arg4[%21, %c0_5] : memref<8x128xf32, #tpu.memory_space<vmem>>, vector<8x128xf32>
    tpu.vector_store %arg4[%21, %c0_5], %20 {strides = array<i32>} : memref<8x128xf32, #tpu.memory_space<vmem>>, vector<8x128xf32>,
    %c1_i32 = arith.constant 1 : i32
    return
  }
  func.func @transform_0(%arg0: i32) -> (i32, i32) {
    %c0_i32 = arith.constant 0 : i32
    %c0_i32_0 = arith.constant 0 : i32
    return %arg0, %c0_i32 : i32, i32
  }
  func.func @transform_1(%arg0: i32) -> (i32, i32) {
    %c0_i32 = arith.constant 0 : i32
    %c0_i32_0 = arith.constant 0 : i32
    %c0_i32_1 = arith.constant 0 : i32
    return %c0_i32, %c0_i32_0 : i32, i32
  }
  func.func @transform_2(%arg0: i32) -> (i32, i32) {
    %c0_i32 = arith.constant 0 : i32
    %c0_i32_0 = arith.constant 0 : i32
    %c0_i32_1 = arith.constant 0 : i32
    return %c0_i32, %c0_i32_0 : i32, i32
  }
  func.func @transform_3(%arg0: i32) -> (i32, i32) {
    %c0_i32 = arith.constant 0 : i32
    %c0_i32_0 = arith.constant 0 : i32
    return %arg0, %c0_i32 : i32, i32
  }
}

module attributes {stable_mosaic.version = 11 : i64} {
  func.func @_long_fusion_kernel(%arg0: i32, %arg1: memref<8x32xf32, #tpu.memory_space<vmem>>, %arg2: memref<32x128xf32, #tpu.memory_space<vmem>>, %arg3: memref<1x128xf32, #tpu.memory_space<vmem>>, %arg4: memref<8x128xf32, #tpu.memory_space<vmem>>) attributes {dimension_semantics = [#tpu.dimension_semantics<parallel>], iteration_bounds = array<i64: 1>, scalar_prefetch = 0 : i64, scratch_operands = 0 : i64, tpu.core_type = #tpu.core_type<tc>, window_params = [{transform_indices = @transform_0, window_bounds = array<i64: 8, 32>}, {pipeline_mode = #tpu.pipeline_mode<synchronous>, transform_indices = @transform_1, window_bounds = array<i64: 32, 128>}, {pipeline_mode = #tpu.pipeline_mode<synchronous>, transform_indices = @transform_2, window_bounds = array<i64: 1, 128>}, {transform_indices = @transform_3, window_bounds = array<i64: 8, 128>}]} {
    %c0_i32 = arith.constant 0 : i32
    %c8_i32 = arith.constant 8 : i32
    %0 = arith.muli %c0_i32, %c8_i32 : i32
    %1 = tpu.assume_multiple %0, 8 : i32
    %2 = arith.index_cast %1 : i32 to index
    %c0 = arith.constant 0 : index
    %3 = vector.load %arg1[%2, %c0] : memref<8x32xf32, #tpu.memory_space<vmem>>, vector<8x32xf32>
    %c0_0 = arith.constant 0 : index
    %c0_1 = arith.constant 0 : index
    %4 = vector.load %arg2[%c0_0, %c0_1] : memref<32x128xf32, #tpu.memory_space<vmem>>, vector<32x128xf32>
    %cst = arith.constant dense<0.000000e+00> : vector<8x128xf32>
    %5 = tpu.matmul %3, %4, %cst {dimension_numbers = #tpu.dot_dimension_numbers<[1], [0], [0], [1], [0, 0, 1, 1], [], []>} : vector<8x32xf32>, vector<32x128xf32>, vector<8x128xf32> -> vector<8x128xf32>
    %c0_2 = arith.constant 0 : index
    %c0_3 = arith.constant 0 : index
    %6 = vector.load %arg3[%c0_2, %c0_3] : memref<1x128xf32, #tpu.memory_space<vmem>>, vector<1x128xf32>
    %7 = vector.broadcast %6 : vector<1x128xf32> to vector<8x128xf32>
    %8 = arith.addf %5, %7 : vector<8x128xf32>
    %9 = math.tanh %8 : vector<8x128xf32>
    %cst_4 = arith.constant 0.000000e+00 : f32
    %10 = vector.broadcast %cst_4 : f32 to vector<8x128xf32>
    %11 = arith.maximumf %9, %10 : vector<8x128xf32>
    %12 = math.tanh %11 : vector<8x128xf32>
    %13 = math.tanh %12 : vector<8x128xf32>
    %14 = math.tanh %13 : vector<8x128xf32>
    %15 = math.tanh %14 : vector<8x128xf32>
    %16 = math.tanh %15 : vector<8x128xf32>
    %17 = math.tanh %16 : vector<8x128xf32>
    %18 = math.tanh %17 : vector<8x128xf32>
    %19 = math.tanh %18 : vector<8x128xf32>
    %20 = math.tanh %19 : vector<8x128xf32>
    %21 = arith.index_cast %1 : i32 to index
    %c0_5 = arith.constant 0 : index
    %22 = vector.load %arg4[%21, %c0_5] : memref<8x128xf32, #tpu.memory_space<vmem>>, vector<8x128xf32>
    tpu.vector_store %arg4[%21, %c0_5], %20 {strides = array<i32>} : memref<8x128xf32, #tpu.memory_space<vmem>>, vector<8x128xf32>,
    %c1_i32 = arith.constant 1 : i32
    return
  }
  func.func @transform_0(%arg0: i32) -> (i32, i32) {
    %c0_i32 = arith.constant 0 : i32
    %c0_i32_0 = arith.constant 0 : i32
    return %arg0, %c0_i32 : i32, i32
  }
  func.func @transform_1(%arg0: i32) -> (i32, i32) {
    %c0_i32 = arith.constant 0 : i32
    %c0_i32_0 = arith.constant 0 : i32
    %c0_i32_1 = arith.constant 0 : i32
    return %c0_i32, %c0_i32_0 : i32, i32
  }
  func.func @transform_2(%arg0: i32) -> (i32, i32) {
    %c0_i32 = arith.constant 0 : i32
    %c0_i32_0 = arith.constant 0 : i32
    %c0_i32_1 = arith.constant 0 : i32
    return %c0_i32, %c0_i32_0 : i32, i32
  }
  func.func @transform_3(%arg0: i32) -> (i32, i32) {
    %c0_i32 = arith.constant 0 : i32
    %c0_i32_0 = arith.constant 0 : i32
    return %arg0, %c0_i32 : i32, i32
  }
}

</mosaic_0001>

<bundles_post_ra>
// kernel: tpu_custom_call.1
= control target key start
LH: loop header
LB: loop body
LE: loop exit
PB: predicated region body
PF: predicated region fallthrough
CT: control target
= control target key end

     0   :  { %8 = vsyncpa [#allocation3], 0  ;;  %s353_s0 = inlined_call_operand.hbm [shape: f32[8,32], index: 0, kind: input, shape index: {}]   ;;  %s354_s1 = inlined_call_operand.hbm [shape: f32[32,128], index: 1, kind: input, shape index: {}]   ;;  %s355_s2 = inlined_call_operand.vmem [shape: f32[1,128], index: 2, kind: input, shape index: {}]   ;;  %s356_s3 = inlined_call_operand.hbm [shape: f32[8,128], index: 3, kind: output, shape index: {}]  }
   0x1   :  { %9 = vsyncpa [#allocation6], 0 }
   0x2   :  { %10 = vsyncpa [#allocation4], 0  ;;  %s279_s12 = smov [#allocation2]   ;;  %s280_s14 = smov [#allocation5]  }
   0x3   :  { %s17_s13 = sshll.u32 %s279_s12, 4  ;;  %s26_s15 = sshll.u32 %s280_s14, 4  ;;  %s18_s13 = int_to_ptr.vmem [resolvable:$true] %s17_s13  ;;  %s307_s15 = int_to_ptr.vmem [resolvable:$true] %s26_s15 }
   0x4   :  { %s207_s18 = scalar_lea.hbm %s353_s0, 128 }
   0x5   :  { %p208_p0 = scmp.ne.s32.totalorder %s353_s0, %s207_s18  ;;  %p211_p1 = scmp.lt.u32.totalorder %s207_s18, %s353_s0 }
   0x7   :  { %p213_p2 = pnand %p211_p1, %p208_p0 }
   0x9   :  { %216 = shalt.err (!%p213_p2)
}
   0xa   :  { %s217_s23 = scalar_lea.vmem %s18_s13, 128  ;;  %p222_p4 = scmp.lt.s32.totalorder %s18_s13, %s18_s13 }
   0xb   :  { %p218_p3 = scmp.ne.s32.totalorder %s18_s13, %s217_s23  ;;  %p223_p5 = scmp.lt.s32.totalorder %s217_s23, %s217_s23 }
   0xd   :  { %p224_p6 = por %p223_p5, %p222_p4 }
   0xf   :  { %p225_p7 = pnand %p224_p6, %p218_p3 }
  0x11   :  { %228 = shalt.err (!%p225_p7)
}
  0x12   :  { %20 = dma.hbm_to_vmem [thread:$0]  %s353_s0, 128, %s18_s13, [#allocation3]  }
  0x13   :  { %s229_s28 = scalar_lea.hbm %s354_s1, 512 }
  0x14   :  { %p230_p8 = scmp.ne.s32.totalorder %s354_s1, %s229_s28  ;;  %p233_p9 = scmp.lt.u32.totalorder %s229_s28, %s354_s1 }
  0x16   :  { %p235_p10 = pnand %p233_p9, %p230_p8 }
  0x18   :  { %238 = shalt.err (!%p235_p10)
}
  0x19   :  { %s239_s6 = scalar_lea.vmem %s307_s15, 512  ;;  %p244_p12 = scmp.lt.s32.totalorder %s307_s15, %s307_s15 }
  0x1a   :  { %p240_p11 = scmp.ne.s32.totalorder %s307_s15, %s239_s6  ;;  %p245_p13 = scmp.lt.s32.totalorder %s239_s6, %s239_s6 }
  0x1c   :  { %p246_p0 = por %p245_p13, %p244_p12 }
  0x1e   :  { %p247_p1 = pnand %p246_p0, %p240_p11 }
  0x20   :  { %250 = shalt.err (!%p247_p1)
}
  0x21   :  { %s281_s0 = smov 128   ;;  %s282_s7 = smov 8  }
  0x22   :  { %32 = dma.hbm_to_vmem [thread:$0]  %s354_s1, 512, %s307_s15, [#allocation6], %s281_s0, %s281_s0, %s282_s7  }
  0x23   :  { %273 = dma.done.wait [#allocation3], 128  }
  0x24   :  { %274 = vsyncadd [#allocation3], 4294967168 }
  0x25   :  { %275 = dma.done.wait [#allocation6], 512  }
  0x26   :  { %276 = vsyncadd [#allocation6], 4294966784  ;;  %v283_v0 = vmov 0.0|0.0   ;;  %vm284_vm0 = vmmov 0   ;;  %v285_v1 = vmov 0.0   ;;  %v42_v2 = vld [vmem:[#allocation5] sm:$0xff] }
  0x27   :  { %173 = vmatprep.subr.bf16.mxu0 %v283_v0  ;;  %170 = vmatprep.mubr.msk.f32.mxu0 %vm284_vm0, %v285_v1  ;;  %v43_v3 = vld [vmem:[#allocation5 + $0x8] sm:$0xff]  ;;  %v44_v4 = vld [vmem:[#allocation5 + $0x10] sm:$0xff]  ;;  %v45_v6 = vld [vmem:[#allocation5 + $0x18] sm:$0xff]  ;;  %vm53_vm1 = vcmask 261120  }
  0x28   :  { %v174_v5 = vpack.c.bf16 %v43_v3, %v42_v2  ;;  %v177_v7 = vpack.c.bf16 %v45_v6, %v44_v4  ;;  %v41_v8 = vld [vmem:[#allocation2] sm:$0xff] }
  0x29   :  { %v155_v9 = vld [vmem:[%s355_s2] ss:$0 sm:$0xff]  ;;  %s286_s2 = smov [#allocation7]  }
  0x2a   :  { %175 = vmatpush3.bf16.msra.mxu0 %v174_v5  ;;  %s145_s11 = sshll.u32 %s286_s2, 4  ;;  %s146_s11 = int_to_ptr.vmem [resolvable:$true] %s145_s11 }
  0x2b   :  { %176 = vmatprep.subr.bf16.mxu0 %v283_v0  ;;  %s251_s12 = scalar_lea.vmem %s146_s11, 128  ;;  %p256_p3 = scmp.lt.s32.totalorder %s146_s11, %s146_s11 }
  0x2c   :  { %p252_p2 = scmp.ne.s32.totalorder %s146_s11, %s251_s12  ;;  %p257_p4 = scmp.lt.s32.totalorder %s251_s12, %s251_s12 }
  0x2e   :  { %178 = vmatpush3.bf16.msra.mxu0 %v177_v7  ;;  %p258_p5 = por %p257_p4, %p256_p3 }
  0x30   :  { %p259_p6 = pnand %p258_p5, %p252_p2 }
  0x31   :  { %171 = vmatmul.mubr.msk.f32.vlgmr.msra.gmra.mrb[0].mxu0 %vm53_vm1, %v41_v8 }
 0x104   :  { %v123_v10 = vpop.f32.mrb[0].mxu0 }
 0x105   :  { %v124_v11 = vadd.f32 %v155_v9, %v123_v10  ;;  %v172_v12 = vpop.f32.mrb[1].mxu0 }
 0x107   :  { %187 = vtanh.f32 %v124_v11 }
 0x111   :  { %v188_v13 = vpop.eup %187 }
 0x112   :  { %v128_v14 = vmax.f32 %v188_v13, 0.0 }
 0x114   :  { %189 = vtanh.f32 %v128_v14 }
 0x11e   :  { %v190_v15 = vpop.eup %189 }
 0x11f   :  { %191 = vtanh.f32 %v190_v15 }
 0x129   :  { %v192_v16 = vpop.eup %191 }
 0x12a   :  { %193 = vtanh.f32 %v192_v16 }
 0x134   :  { %v194_v17 = vpop.eup %193 }
 0x135   :  { %195 = vtanh.f32 %v194_v17 }
 0x13f   :  { %v196_v18 = vpop.eup %195 }
 0x140   :  { %197 = vtanh.f32 %v196_v18 }
 0x14a   :  { %v198_v19 = vpop.eup %197 }
 0x14b   :  { %199 = vtanh.f32 %v198_v19 }
 0x155   :  { %v200_v20 = vpop.eup %199 }
 0x156   :  { %201 = vtanh.f32 %v200_v20 }
 0x160   :  { %v202_v21 = vpop.eup %201 }
 0x161   :  { %203 = vtanh.f32 %v202_v21 }
 0x16b   :  { %v204_v22 = vpop.eup %203 }
 0x16c   :  { %205 = vtanh.f32 %v204_v22 }
 0x176   :  { %v206_v23 = vpop.eup %205 }
 0x177   :  { %138 = vst [vmem:[#allocation7] sm:$0xff] %v206_v23 }
 0x178   :  { %262 = shalt.err (!%p259_p6)
}
 0x179   :  { %s263_s15 = scalar_lea.hbm %s356_s3, 128 }
 0x17a   :  { %p264_p7 = scmp.ne.s32.totalorder %s356_s3, %s263_s15  ;;  %p267_p8 = scmp.lt.u32.totalorder %s263_s15, %s356_s3 }
 0x17c   :  { %p269_p9 = pnand %p267_p8, %p264_p7 }
 0x17e   :  { %272 = shalt.err (!%p269_p9)
}
 0x17f   :  { %148 = dma.vmem_to_hbm [thread:$0]  %s146_s11, 128, %s356_s3, [#allocation4]  }
 0x180   :  { %277 = dma.done.wait [#allocation4], 128  }
 0x181   :  { %278 = vsyncadd [#allocation4], 4294967168 }
 0x182   :  { %152 = vsyncpa [#allocation3], 1 }
 0x183   :  { %153 = vsyncpa [#allocation6], 1 }
 0x184   :  { %154 = vsyncpa [#allocation4], 1 }

// kernel: tpu_custom_call.1
= control target key start
LH: loop header
LB: loop body
LE: loop exit
PB: predicated region body
PF: predicated region fallthrough
CT: control target
= control target key end

     0   :  { %8 = vsyncpa [#allocation3], 0  ;;  %s353_s0 = inlined_call_operand.hbm [shape: f32[8,32], index: 0, kind: input, shape index: {}]   ;;  %s354_s1 = inlined_call_operand.hbm [shape: f32[32,128], index: 1, kind: input, shape index: {}]   ;;  %s355_s2 = inlined_call_operand.vmem [shape: f32[1,128], index: 2, kind: input, shape index: {}]   ;;  %s356_s3 = inlined_call_operand.hbm [shape: f32[8,128], index: 3, kind: output, shape index: {}]  }
   0x1   :  { %9 = vsyncpa [#allocation6], 0 }
   0x2   :  { %10 = vsyncpa [#allocation4], 0  ;;  %s279_s12 = smov [#allocation2]   ;;  %s280_s14 = smov [#allocation5]  }
   0x3   :  { %s17_s13 = sshll.u32 %s279_s12, 4  ;;  %s26_s15 = sshll.u32 %s280_s14, 4  ;;  %s18_s13 = int_to_ptr.vmem [resolvable:$true] %s17_s13  ;;  %s307_s15 = int_to_ptr.vmem [resolvable:$true] %s26_s15 }
   0x4   :  { %s207_s18 = scalar_lea.hbm %s353_s0, 128 }
   0x5   :  { %p208_p0 = scmp.ne.s32.totalorder %s353_s0, %s207_s18  ;;  %p211_p1 = scmp.lt.u32.totalorder %s207_s18, %s353_s0 }
   0x7   :  { %p213_p2 = pnand %p211_p1, %p208_p0 }
   0x9   :  { %216 = shalt.err (!%p213_p2)
}
   0xa   :  { %s217_s23 = scalar_lea.vmem %s18_s13, 128  ;;  %p222_p4 = scmp.lt.s32.totalorder %s18_s13, %s18_s13 }
   0xb   :  { %p218_p3 = scmp.ne.s32.totalorder %s18_s13, %s217_s23  ;;  %p223_p5 = scmp.lt.s32.totalorder %s217_s23, %s217_s23 }
   0xd   :  { %p224_p6 = por %p223_p5, %p222_p4 }
   0xf   :  { %p225_p7 = pnand %p224_p6, %p218_p3 }
  0x11   :  { %228 = shalt.err (!%p225_p7)
}
  0x12   :  { %20 = dma.hbm_to_vmem [thread:$0]  %s353_s0, 128, %s18_s13, [#allocation3]  }
  0x13   :  { %s229_s28 = scalar_lea.hbm %s354_s1, 512 }
  0x14   :  { %p230_p8 = scmp.ne.s32.totalorder %s354_s1, %s229_s28  ;;  %p233_p9 = scmp.lt.u32.totalorder %s229_s28, %s354_s1 }
  0x16   :  { %p235_p10 = pnand %p233_p9, %p230_p8 }
  0x18   :  { %238 = shalt.err (!%p235_p10)
}
  0x19   :  { %s239_s6 = scalar_lea.vmem %s307_s15, 512  ;;  %p244_p12 = scmp.lt.s32.totalorder %s307_s15, %s307_s15 }
  0x1a   :  { %p240_p11 = scmp.ne.s32.totalorder %s307_s15, %s239_s6  ;;  %p245_p13 = scmp.lt.s32.totalorder %s239_s6, %s239_s6 }
  0x1c   :  { %p246_p0 = por %p245_p13, %p244_p12 }
  0x1e   :  { %p247_p1 = pnand %p246_p0, %p240_p11 }
  0x20   :  { %250 = shalt.err (!%p247_p1)
}
  0x21   :  { %s281_s0 = smov 128   ;;  %s282_s7 = smov 8  }
  0x22   :  { %32 = dma.hbm_to_vmem [thread:$0]  %s354_s1, 512, %s307_s15, [#allocation6], %s281_s0, %s281_s0, %s282_s7  }
  0x23   :  { %273 = dma.done.wait [#allocation3], 128  }
  0x24   :  { %274 = vsyncadd [#allocation3], 4294967168 }
  0x25   :  { %275 = dma.done.wait [#allocation6], 512  }
  0x26   :  { %276 = vsyncadd [#allocation6], 4294966784  ;;  %v283_v0 = vmov 0.0|0.0   ;;  %vm284_vm0 = vmmov 0   ;;  %v285_v1 = vmov 0.0   ;;  %v42_v2 = vld [vmem:[#allocation5] sm:$0xff] }
  0x27   :  { %173 = vmatprep.subr.bf16.mxu0 %v283_v0  ;;  %170 = vmatprep.mubr.msk.f32.mxu0 %vm284_vm0, %v285_v1  ;;  %v43_v3 = vld [vmem:[#allocation5 + $0x8] sm:$0xff]  ;;  %v44_v4 = vld [vmem:[#allocation5 + $0x10] sm:$0xff]  ;;  %v45_v6 = vld [vmem:[#allocation5 + $0x18] sm:$0xff]  ;;  %vm53_vm1 = vcmask 261120  }
  0x28   :  { %v174_v5 = vpack.c.bf16 %v43_v3, %v42_v2  ;;  %v177_v7 = vpack.c.bf16 %v45_v6, %v44_v4  ;;  %v41_v8 = vld [vmem:[#allocation2] sm:$0xff] }
  0x29   :  { %v155_v9 = vld [vmem:[%s355_s2] ss:$0 sm:$0xff]  ;;  %s286_s2 = smov [#allocation7]  }
  0x2a   :  { %175 = vmatpush3.bf16.msra.mxu0 %v174_v5  ;;  %s145_s11 = sshll.u32 %s286_s2, 4  ;;  %s146_s11 = int_to_ptr.vmem [resolvable:$true] %s145_s11 }
  0x2b   :  { %176 = vmatprep.subr.bf16.mxu0 %v283_v0  ;;  %s251_s12 = scalar_lea.vmem %s146_s11, 128  ;;  %p256_p3 = scmp.lt.s32.totalorder %s146_s11, %s146_s11 }
  0x2c   :  { %p252_p2 = scmp.ne.s32.totalorder %s146_s11, %s251_s12  ;;  %p257_p4 = scmp.lt.s32.totalorder %s251_s12, %s251_s12 }
  0x2e   :  { %178 = vmatpush3.bf16.msra.mxu0 %v177_v7  ;;  %p258_p5 = por %p257_p4, %p256_p3 }
  0x30   :  { %p259_p6 = pnand %p258_p5, %p252_p2 }
  0x31   :  { %171 = vmatmul.mubr.msk.f32.vlgmr.msra.gmra.mrb[0].mxu0 %vm53_vm1, %v41_v8 }
 0x104   :  { %v123_v10 = vpop.f32.mrb[0].mxu0 }
 0x105   :  { %v124_v11 = vadd.f32 %v155_v9, %v123_v10  ;;  %v172_v12 = vpop.f32.mrb[1].mxu0 }
 0x107   :  { %187 = vtanh.f32 %v124_v11 }
 0x111   :  { %v188_v13 = vpop.eup %187 }
 0x112   :  { %v128_v14 = vmax.f32 %v188_v13, 0.0 }
 0x114   :  { %189 = vtanh.f32 %v128_v14 }
 0x11e   :  { %v190_v15 = vpop.eup %189 }
 0x11f   :  { %191 = vtanh.f32 %v190_v15 }
 0x129   :  { %v192_v16 = vpop.eup %191 }
 0x12a   :  { %193 = vtanh.f32 %v192_v16 }
 0x134   :  { %v194_v17 = vpop.eup %193 }
 0x135   :  { %195 = vtanh.f32 %v194_v17 }
 0x13f   :  { %v196_v18 = vpop.eup %195 }
 0x140   :  { %197 = vtanh.f32 %v196_v18 }
 0x14a   :  { %v198_v19 = vpop.eup %197 }
 0x14b   :  { %199 = vtanh.f32 %v198_v19 }
 0x155   :  { %v200_v20 = vpop.eup %199 }
 0x156   :  { %201 = vtanh.f32 %v200_v20 }
 0x160   :  { %v202_v21 = vpop.eup %201 }
 0x161   :  { %203 = vtanh.f32 %v202_v21 }
 0x16b   :  { %v204_v22 = vpop.eup %203 }
 0x16c   :  { %205 = vtanh.f32 %v204_v22 }
 0x176   :  { %v206_v23 = vpop.eup %205 }
 0x177   :  { %138 = vst [vmem:[#allocation7] sm:$0xff] %v206_v23 }
 0x178   :  { %262 = shalt.err (!%p259_p6)
}
 0x179   :  { %s263_s15 = scalar_lea.hbm %s356_s3, 128 }
 0x17a   :  { %p264_p7 = scmp.ne.s32.totalorder %s356_s3, %s263_s15  ;;  %p267_p8 = scmp.lt.u32.totalorder %s263_s15, %s356_s3 }
 0x17c   :  { %p269_p9 = pnand %p267_p8, %p264_p7 }
 0x17e   :  { %272 = shalt.err (!%p269_p9)
}
 0x17f   :  { %148 = dma.vmem_to_hbm [thread:$0]  %s146_s11, 128, %s356_s3, [#allocation4]  }
 0x180   :  { %277 = dma.done.wait [#allocation4], 128  }
 0x181   :  { %278 = vsyncadd [#allocation4], 4294967168 }
 0x182   :  { %152 = vsyncpa [#allocation3], 1 }
 0x183   :  { %153 = vsyncpa [#allocation6], 1 }
 0x184   :  { %154 = vsyncpa [#allocation4], 1 }

</bundles_post_ra>
